<compile_context>
chip_gen: v5e
topology: v5e:2x2
jax: 0.10.0
libtpu: 0.0.40
codegen_flags: <defaults>
</compile_context>

<pallas_src>
import jax
import jax.numpy as jnp
from jax.experimental import pallas as pl
from jax.experimental.pallas import tpu as pltpu


def _round_up(x, m):
    return ((x + m - 1) // m) * m


def _tpu_vmem_capacity_bytes():
    """Physical VMEM per core; conservative (v7x-sized) fallback if unqueryable."""
    try:
        return int(pltpu.get_tpu_info().vmem_capacity_bytes)
    except Exception:
        return 64 * 1024 * 1024


# ---------------------------------------------------------------------------
# Kernel A: weight-resident.  grid = (row_tiles,)
#   Both weight matrices sit in VMEM for the whole call; each row tile only
#   moves activations through HBM.  No accumulator scratch needed.
# ---------------------------------------------------------------------------
def ffn_resident_kernel(x_ref, w1_ref, b1_ref, w2_ref, b2_ref, o_ref):
    x = x_ref[...].astype(w1_ref.dtype)                 # cast on-core, not in wrapper
    h = jnp.dot(x, w1_ref[...], preferred_element_type=jnp.float32)
    h = jnp.maximum(h + b1_ref[...], 0.0)
    # dropout: identity (eval mode)
    out = jnp.dot(h.astype(w2_ref.dtype), w2_ref[...],
                  preferred_element_type=jnp.float32) + b2_ref[...]
    o_ref[...] = out.astype(o_ref.dtype)


# ---------------------------------------------------------------------------
# Kernel B: d_ff-streaming fallback.  grid = (row_tiles, ff_tiles)
#   Used only when the weights do not fit in VMEM.  fc_2 accumulates into a
#   resident f32 scratch; the first k-step stores the partial product directly
#   (no zero-fill read-modify-write); b2 is added exactly once at finalize.
# ---------------------------------------------------------------------------
def ffn_streaming_kernel(x_ref, w1_ref, b1_ref, w2_ref, b2_ref, o_ref, acc_ref):
    k = pl.program_id(1)

    x = x_ref[...].astype(w1_ref.dtype)
    h = jnp.dot(x, w1_ref[...], preferred_element_type=jnp.float32)
    h = jnp.maximum(h + b1_ref[...], 0.0)
    # dropout: identity (eval mode)
    partial = jnp.dot(h.astype(w2_ref.dtype), w2_ref[...],
                      preferred_element_type=jnp.float32)

    @pl.when(k == 0)
    def _first():
        acc_ref[...] = partial

    @pl.when(k != 0)
    def _rest():
        acc_ref[...] += partial

    @pl.when(k == pl.num_programs(1) - 1)
    def _finalize():
        o_ref[...] = (acc_ref[...] + b2_ref[...]).astype(o_ref.dtype)


def feed_forward(x, w1_t, b1, w2_t, b2, *, block_rows=None, ff_tile=None,
                 compute_dtype=jnp.bfloat16, out_dtype=None, vmem_limit_bytes=None):
    """Position-wise FFN:  fc_2(dropout(relu(fc_1(x)))), dropout = identity (eval).

    x:    [batch, len, d_model]  (any float dtype; cast to compute_dtype on-core)
    w1_t: [d_model, d_ff]   fc_1 weight pre-transposed to (in, out)
    w2_t: [d_ff, d_model]   fc_2 weight pre-transposed to (in, out)
    b1:   [d_ff],  b2: [d_model]

    For best performance pass w1_t / w2_t already in `compute_dtype` (the demo
    pre-casts them once outside the hot path).
    """
    orig_dtype = x.dtype
    out_dtype = orig_dtype if out_dtype is None else out_dtype
    B, L, D = x.shape
    d_ff = w1_t.shape[1]
    rows = B * L

    # Weights / biases: cast only if the caller did not pre-cast.
    w1c = w1_t if w1_t.dtype == compute_dtype else w1_t.astype(compute_dtype)
    w2c = w2_t if w2_t.dtype == compute_dtype else w2_t.astype(compute_dtype)
    b1_2d = b1.reshape(1, d_ff).astype(jnp.float32)
    b2_2d = b2.reshape(1, D).astype(jnp.float32)

    wbytes = jnp.dtype(compute_dtype).itemsize
    xbytes = jnp.dtype(orig_dtype).itemsize
    obytes = jnp.dtype(out_dtype).itemsize
    weight_bytes = 2 * D * d_ff * wbytes

    capacity = _tpu_vmem_capacity_bytes()
    if vmem_limit_bytes is None:
        # leave headroom for compiler-internal scratch; cap at ~110 MiB on 128 MiB parts
        vmem_limit_bytes = max(32 << 20, min(capacity - (8 << 20), 110 << 20))

    # Weight-resident when a single copy of both matrices fits comfortably in VMEM
    # (e.g. d_model=1024, d_ff=4096 bf16 -> 16 MiB: resident even on v7x's 64 MiB).
    resident = weight_bytes <= int(0.4 * capacity)

    # Row tile: large enough to keep the MXU busy, small enough for VMEM, and
    # re-derived from the row count so padding waste stays < 8 rows per tile.
    if block_rows is None:
        if resident:
            target = 512
            # keep the f32 + bf16 `h` intermediate (6 B/elt) within ~1/4 of VMEM
            max_rows_h = ((capacity // 4) // (6 * d_ff)) // 8 * 8
            if max_rows_h >= 128:
                target = min(target, max_rows_h)
        else:
            # streaming re-fetches the weights once per row tile: bigger tiles on
            # 128 MiB parts (v5e/v6e) hide the weight DMA; 512 fits v7x's 64 MiB.
            target = 1024 if capacity >= (96 << 20) else 512
        block_rows = target
    num_row_tiles = max(1, pl.cdiv(rows, block_rows))
    block_rows = _round_up(pl.cdiv(rows, num_row_tiles), 8)
    rows_p = block_rows * num_row_tiles

    x2 = x.reshape(rows, D)
    if rows_p != rows:
        x2 = jnp.pad(x2, ((0, rows_p - rows), (0, 0)))   # < 8*num_row_tiles rows of pad

    flops = 4 * rows_p * D * d_ff                         # two matmuls, 2 flops/MAC
    weight_passes = 1 if resident else num_row_tiles
    bytes_accessed = (rows_p * D * xbytes + rows_p * D * obytes
                      + weight_passes * weight_bytes + 4 * (d_ff + D))

    if resident:
        # Constant index_map => weights DMA'd once and kept resident.  Single-buffer
        # them when large: double-buffering a never-changing block only wastes VMEM.
        if weight_bytes >= (4 << 20):
            w_spec_kwargs = dict(pipeline_mode=pl.Buffered(1))
        else:
            w_spec_kwargs = {}
        grid_spec = pltpu.PrefetchScalarGridSpec(
            num_scalar_prefetch=0,
            grid=(num_row_tiles,),
            in_specs=[
                pl.BlockSpec((block_rows, D), lambda i: (i, 0)),               # x row tile
                pl.BlockSpec((D, d_ff), lambda i: (0, 0), **w_spec_kwargs),    # W1^T resident
                pl.BlockSpec((1, d_ff), lambda i: (0, 0)),                     # b1
                pl.BlockSpec((d_ff, D), lambda i: (0, 0), **w_spec_kwargs),    # W2^T resident
                pl.BlockSpec((1, D), lambda i: (0, 0)),                        # b2
            ],
            out_specs=pl.BlockSpec((block_rows, D), lambda i: (i, 0)),
        )
        kernel = ffn_resident_kernel
        dim_sem = ("parallel",)
    else:
        if ff_tile is None:
            ff_tile = d_ff
            for cand in (1024, 512, 256, 128):
                if d_ff % cand == 0:
                    ff_tile = cand
                    break
        num_ff_tiles = d_ff // ff_tile
        grid_spec = pltpu.PrefetchScalarGridSpec(
            num_scalar_prefetch=0,
            grid=(num_row_tiles, num_ff_tiles),
            in_specs=[
                pl.BlockSpec((block_rows, D), lambda i, k: (i, 0)),  # x row tile
                pl.BlockSpec((D, ff_tile),    lambda i, k: (0, k)),  # W1^T d_ff chunk
                pl.BlockSpec((1, ff_tile),    lambda i, k: (0, k)),  # b1 chunk
                pl.BlockSpec((ff_tile, D),    lambda i, k: (k, 0)),  # W2^T d_ff chunk
                pl.BlockSpec((1, D),          lambda i, k: (0, 0)),  # b2 (finalize only)
            ],
            out_specs=pl.BlockSpec((block_rows, D), lambda i, k: (i, 0)),
            scratch_shapes=[pltpu.VMEM((block_rows, D), jnp.float32)],
        )
        kernel = ffn_streaming_kernel
        dim_sem = ("parallel", "arbitrary")

    out2 = pl.pallas_call(
        kernel,
        out_shape=jax.ShapeDtypeStruct((rows_p, D), out_dtype),
        grid_spec=grid_spec,
        compiler_params=pltpu.CompilerParams(
            dimension_semantics=dim_sem,
            vmem_limit_bytes=int(vmem_limit_bytes)),
        cost_estimate=pl.CostEstimate(flops=int(flops), transcendentals=0,
                                      bytes_accessed=int(bytes_accessed)),
    )(x2, w1c, b1_2d, w2c, b2_2d)

    if rows_p != rows:
        out2 = out2[:rows]
    return out2.reshape(B, L, D)


if __name__ == "__main__":
    # Small shapes consistent with the module: batch x len x d_model
    batch, seq, d_model, d_ff = 2, 8, 32, 64
    key = jax.random.PRNGKey(0)
    kx, kw1, kb1, kw2, kb2 = jax.random.split(key, 5)

    x = jax.random.normal(kx, (batch, seq, d_model), dtype=jnp.float32)

    # Parameters stored pre-transposed (in, out) and pre-cast ONCE to bf16
    # (out of the hot path, per the perf review).
    w1_t = (jax.random.normal(kw1, (d_model, d_ff), dtype=jnp.float32)
            * (2.0 / d_model) ** 0.5)
    b1 = jax.random.normal(kb1, (d_ff,), dtype=jnp.float32) * 0.01
    w2_t = (jax.random.normal(kw2, (d_ff, d_model), dtype=jnp.float32)
            * (1.0 / d_ff) ** 0.5)
    b2 = jax.random.normal(kb2, (d_model,), dtype=jnp.float32) * 0.01
    w1_bf = w1_t.astype(jnp.bfloat16)
    w2_bf = w2_t.astype(jnp.bfloat16)

    out = feed_forward(x, w1_bf, b1, w2_bf, b2)
    out = jax.block_until_ready(out)

    # Pure-JAX reference mirroring the kernel's bf16 compute / f32 accumulate precision.
    f32 = jnp.float32
    xb = x.astype(jnp.bfloat16).astype(f32)
    w1f = w1_bf.astype(f32)
    w2f = w2_bf.astype(f32)
    h = jnp.maximum(xb @ w1f + b1, 0.0)
    ref = h.astype(jnp.bfloat16).astype(f32) @ w2f + b2

    assert out.shape == (batch, seq, d_model)
    assert jnp.allclose(out, ref, atol=2e-2, rtol=2e-2), "mismatch vs reference"

    print("KERNEL_OK")
</pallas_src>

<mosaic_0001>
module attributes {stable_mosaic.version = 11 : i64} {
  func.func @ffn_resident_kernel(%arg0: i32, %arg1: memref<16x32xf32, #tpu.memory_space<vmem>>, %arg2: memref<32x64xbf16, #tpu.memory_space<vmem>>, %arg3: memref<1x64xf32, #tpu.memory_space<vmem>>, %arg4: memref<64x32xbf16, #tpu.memory_space<vmem>>, %arg5: memref<1x32xf32, #tpu.memory_space<vmem>>, %arg6: memref<16x32xf32, #tpu.memory_space<vmem>>) attributes {dimension_semantics = [#tpu.dimension_semantics<parallel>], iteration_bounds = array<i64: 1>, scalar_prefetch = 0 : i64, scratch_operands = 0 : i64, tpu.core_type = #tpu.core_type<tc>, window_params = [{transform_indices = @transform_0, window_bounds = array<i64: 16, 32>}, {pipeline_mode = #tpu.pipeline_mode<synchronous>, transform_indices = @transform_1, window_bounds = array<i64: 32, 64>}, {pipeline_mode = #tpu.pipeline_mode<synchronous>, transform_indices = @transform_2, window_bounds = array<i64: 1, 64>}, {pipeline_mode = #tpu.pipeline_mode<synchronous>, transform_indices = @transform_3, window_bounds = array<i64: 64, 32>}, {pipeline_mode = #tpu.pipeline_mode<synchronous>, transform_indices = @transform_4, window_bounds = array<i64: 1, 32>}, {transform_indices = @transform_5, window_bounds = array<i64: 16, 32>}]} {
    %c0 = arith.constant 0 : index
    %c0_0 = arith.constant 0 : index
    %0 = vector.load %arg1[%c0, %c0_0] : memref<16x32xf32, #tpu.memory_space<vmem>>, vector<16x32xf32>
    %1 = arith.truncf %0 : vector<16x32xf32> to vector<16x32xbf16>
    %c0_1 = arith.constant 0 : index
    %c0_2 = arith.constant 0 : index
    %2 = vector.load %arg2[%c0_1, %c0_2] : memref<32x64xbf16, #tpu.memory_space<vmem>>, vector<32x64xbf16>
    %cst = arith.constant dense<0.000000e+00> : vector<16x64xf32>
    %3 = tpu.matmul %1, %2, %cst {dimension_numbers = #tpu.dot_dimension_numbers<[1], [0], [0], [1], [0, 0, 1, 1], [], []>} : vector<16x32xbf16>, vector<32x64xbf16>, vector<16x64xf32> -> vector<16x64xf32>
    %c0_3 = arith.constant 0 : index
    %c0_4 = arith.constant 0 : index
    %4 = vector.load %arg3[%c0_3, %c0_4] : memref<1x64xf32, #tpu.memory_space<vmem>>, vector<1x64xf32>
    %5 = vector.broadcast %4 : vector<1x64xf32> to vector<16x64xf32>
    %6 = arith.addf %3, %5 : vector<16x64xf32>
    %cst_5 = arith.constant 0.000000e+00 : f32
    %7 = vector.broadcast %cst_5 : f32 to vector<16x64xf32>
    %8 = arith.maximumf %6, %7 : vector<16x64xf32>
    %9 = arith.truncf %8 : vector<16x64xf32> to vector<16x64xbf16>
    %c0_6 = arith.constant 0 : index
    %c0_7 = arith.constant 0 : index
    %10 = vector.load %arg4[%c0_6, %c0_7] : memref<64x32xbf16, #tpu.memory_space<vmem>>, vector<64x32xbf16>
    %cst_8 = arith.constant dense<0.000000e+00> : vector<16x32xf32>
    %11 = tpu.matmul %9, %10, %cst_8 {dimension_numbers = #tpu.dot_dimension_numbers<[1], [0], [0], [1], [0, 0, 1, 1], [], []>} : vector<16x64xbf16>, vector<64x32xbf16>, vector<16x32xf32> -> vector<16x32xf32>
    %c0_9 = arith.constant 0 : index
    %c0_10 = arith.constant 0 : index
    %12 = vector.load %arg5[%c0_9, %c0_10] : memref<1x32xf32, #tpu.memory_space<vmem>>, vector<1x32xf32>
    %13 = vector.broadcast %12 : vector<1x32xf32> to vector<16x32xf32>
    %14 = arith.addf %11, %13 : vector<16x32xf32>
    %c0_11 = arith.constant 0 : index
    %c0_12 = arith.constant 0 : index
    %15 = vector.load %arg6[%c0_11, %c0_12] : memref<16x32xf32, #tpu.memory_space<vmem>>, vector<16x32xf32>
    tpu.vector_store %arg6[%c0_11, %c0_12], %14 {strides = array<i32>} : memref<16x32xf32, #tpu.memory_space<vmem>>, vector<16x32xf32>,
    return
  }
  func.func @transform_0(%arg0: i32) -> (i32, i32) {
    %c0_i32 = arith.constant 0 : i32
    %c0_i32_0 = arith.constant 0 : i32
    return %arg0, %c0_i32 : i32, i32
  }
  func.func @transform_1(%arg0: i32) -> (i32, i32) {
    %c0_i32 = arith.constant 0 : i32
    %c0_i32_0 = arith.constant 0 : i32
    %c0_i32_1 = arith.constant 0 : i32
    return %c0_i32, %c0_i32_0 : i32, i32
  }
  func.func @transform_2(%arg0: i32) -> (i32, i32) {
    %c0_i32 = arith.constant 0 : i32
    %c0_i32_0 = arith.constant 0 : i32
    %c0_i32_1 = arith.constant 0 : i32
    return %c0_i32, %c0_i32_0 : i32, i32
  }
  func.func @transform_3(%arg0: i32) -> (i32, i32) {
    %c0_i32 = arith.constant 0 : i32
    %c0_i32_0 = arith.constant 0 : i32
    %c0_i32_1 = arith.constant 0 : i32
    return %c0_i32, %c0_i32_0 : i32, i32
  }
  func.func @transform_4(%arg0: i32) -> (i32, i32) {
    %c0_i32 = arith.constant 0 : i32
    %c0_i32_0 = arith.constant 0 : i32
    %c0_i32_1 = arith.constant 0 : i32
    return %c0_i32, %c0_i32_0 : i32, i32
  }
  func.func @transform_5(%arg0: i32) -> (i32, i32) {
    %c0_i32 = arith.constant 0 : i32
    %c0_i32_0 = arith.constant 0 : i32
    return %arg0, %c0_i32 : i32, i32
  }
}

</mosaic_0001>

<bundles_post_ra>
// kernel: tpu_custom_call.1
= control target key start
LH: loop header
LB: loop body
LE: loop exit
PB: predicated region body
PF: predicated region fallthrough
CT: control target
= control target key end

     0   :  { %s272_s0 = inlined_call_operand.vmem [shape: f32[16,32], index: 0, kind: input, shape index: {}]   ;;  %s273_s1 = inlined_call_operand.vmem [shape: bf16[32,64], index: 1, kind: input, shape index: {}]   ;;  %s274_s2 = inlined_call_operand.vmem [shape: f32[1,64], index: 2, kind: input, shape index: {}]   ;;  %s275_s3 = inlined_call_operand.vmem [shape: bf16[64,32], index: 3, kind: input, shape index: {}]   ;;  %s276_s4 = inlined_call_operand.vmem [shape: f32[1,32], index: 4, kind: input, shape index: {}]   ;;  %s277_s5 = inlined_call_operand.hbm [shape: f32[16,32], index: 5, kind: output, shape index: {}]  }
   0x1   :  { %v167_v0 = vld [vmem:[%s273_s1 + $0x8] sm:$0xff]  ;;  %v166_v1 = vld [vmem:[%s273_s1] sm:$0xff] }
   0x2   :  { %v22_v2 = vld [vmem:[%s272_s0] sm:$0xff]  ;;  %55 = vmatpush.bf16.msra.mxu0 %v167_v0  ;;  %v23_v3 = vld [vmem:[%s272_s0 + $0x8] sm:$0xff] }
   0x3   :  { %10 = vsyncpa [#allocation3], 0  ;;  %v24_v4 = vpack.c.bf16 %v23_v3, %v22_v2  ;;  %vm45_vm0 = vcmask 261120   ;;  %v171_v5 = vld [vmem:[%s275_s3 + $0x18] sm:$0xff]  ;;  %v170_v6 = vld [vmem:[%s275_s3 + $0x10] sm:$0xff]  ;;  %vm102_vm1 = vcmask 523264  }
   0x4   :  { %110 = vmatpush.bf16.msra.mxu1 %v171_v5  ;;  %v169_v7 = vld [vmem:[%s275_s3 + $0x8] sm:$0xff]  ;;  %v168_v8 = vld [vmem:[%s275_s3] sm:$0xff]  ;;  %s203_s3 = smov [#allocation2]   ;;  %s128_s13 = sshll.u32 %s277_s5, 4  ;;  %s129_s13 = int_to_ptr.hbm [resolvable:$true] %s128_s13 }
   0x5   :  { %v175_v10 = vld [vmem:[%s274_s2] ss:$0 sm:$0xff]  ;;  %s126_s11 = sshll.u32 %s203_s3, 4  ;;  %s204_s14 = smov 128   ;;  %s127_s11 = int_to_ptr.vmem [resolvable:$true] %s126_s11 }
   0x6   :  { %56 = vmatpush.bf16.msra.mxu0 %v166_v1  ;;  %v176_v17 = vld [vmem:[%s276_s4] ss:$0 sm:$0xff]  ;;  %s205_s15 = smov 8  }
   0x8   :  { %111 = vmatpush.bf16.msra.mxu1 %v170_v6 }
   0x9   :  { %148 = vmatmul.msk.bf16.vlgmr.msra.gmra.mxu0 %vm45_vm0, %v24_v4 }
   0xc   :  { %112 = vmatpush.bf16.msra.mxu1 %v169_v7 }
  0x10   :  { %113 = vmatpush.bf16.msra.mxu1 %v168_v8 }
  0x86   :  { %v58_v9 = vpop.f32.mrf.mxu0 }
  0x87   :  { %v59_v11 = vadd.f32 %v175_v10, %v58_v9 }
  0x89   :  { %v63_v14 = vmax.f32 %v59_v11, 0.0 }
  0x8e   :  { %v60_v12 = vpop.f32.mrf.mxu0 }
  0x8f   :  { %v61_v13 = vadd.f32 %v175_v10, %v60_v12 }
  0x91   :  { %v64_v15 = vmax.f32 %v61_v13, 0.0 }
  0x93   :  { %v65_v16 = vpack.c.bf16 %v64_v15, %v63_v14 }
  0x95   :  { %165 = vmatmul.msk.bf16.vlgmr.msra.gmra.mxu1 %vm102_vm1, %v65_v16 }
 0x112   :  { %v115_v18 = vpop.f32.mrf.mxu1 }
 0x113   :  { %v116_v19 = vadd.f32 %v176_v17, %v115_v18 }
 0x115   :  { %120 = vst.msk [vmem:[#allocation2] sm:$0xff] %vm45_vm0, %v116_v19 }
 0x11a   :  { %v117_v20 = vpop.f32.mrf.mxu1 }
 0x11b   :  { %v118_v21 = vadd.f32 %v176_v17, %v117_v20 }
 0x11d   :  { %121 = vst.msk [vmem:[#allocation2 + $0x8] sm:$0xff] %vm45_vm0, %v118_v21 }
 0x11e   :  { %134 = dma.vmem_to_hbm [thread:$0]  %s127_s11, 256, %s129_s13, [#allocation3], %s204_s14, %s204_s14, %s205_s15  }
 0x11f   :  { %201 = dma.done.wait [#allocation3], 256  }
 0x120   :  { %202 = vsyncadd [#allocation3], 4294967040 }
 0x121   :  { %139 = vsyncpa [#allocation3], 1 }

</bundles_post_ra>
